<compile_context>
chip_gen: v6e
topology: v6e:2x2x1
jax: 0.10.0
libtpu: 0.0.40
codegen_flags: <defaults>
</compile_context>

<pallas_src>
import functools

import jax
import jax.numpy as jnp
from jax.experimental import pallas as pl
from jax.experimental.pallas import tpu as pltpu

EPS = 1e-5


def _round_up(x, m):
    return (x + m - 1) // m * m


def _pad2d(a, rows, cols):
    r, c = a.shape
    return jnp.pad(a, ((0, rows - r), (0, cols - c)))


def _pick_tile(total, target):
    """Largest multiple of 128 <= target that divides `total` (total % 128 == 0)."""
    best = 128
    t = 128
    while t <= min(target, total):
        if total % t == 0:
            best = t
        t += 128
    return best


def _linear_layer_kernel(x_ref, w_ref, bgb_ref, o_ref, *, b_real, use_bn):
    """Grid = (Hp//tn, Kp//tk).  x_ref:(Bp,tk) bf16, w_ref:(tk,tn) bf16,
    bgb_ref:(3,tn) f32 = [bias; gamma; beta], o_ref:(Bp,tn) f32 (resident
    accumulator across the inner K axis)."""
    k = pl.program_id(1)
    nk = pl.num_programs(1)

    @pl.when(k == 0)
    def _init():
        # Seed the resident output block with the broadcast bias (folds the
        # bias add into the accumulator init).
        o_ref[...] = jnp.broadcast_to(bgb_ref[0:1, :], o_ref.shape)

    # bf16 x bf16 -> f32 accumulate on the MXU, directly into the f32 output.
    o_ref[...] += jnp.dot(x_ref[...], w_ref[...],
                          preferred_element_type=jnp.float32)

    @pl.when(k == nk - 1)
    def _finalize():
        h = jnp.maximum(o_ref[...], 0.0)            # ReLU, (Bp, tn) f32
        if use_bn:
            # BN stats are per-feature over the batch; the whole (padded)
            # batch lives in this block, so tiling N does not break them.
            # Padded batch rows must not contribute to the statistics.
            row = jax.lax.broadcasted_iota(jnp.int32, h.shape, 0)
            mask = (row < b_real).astype(jnp.float32)
            inv_n = 1.0 / float(b_real)
            mean = jnp.sum(h * mask, axis=0, keepdims=True) * inv_n
            d = (h - mean) * mask                   # two-pass centered variance
            var = jnp.sum(d * d, axis=0, keepdims=True) * inv_n
            scale = bgb_ref[1:2, :] * jax.lax.rsqrt(var + EPS)  # gamma folded in
            shift = bgb_ref[2:3, :] - mean * scale
            h = h * scale + shift
        o_ref[...] = h


def prepare_params(params, *, block_k=512, block_n=512):
    """One-time padding / bf16 cast of the weights and packing of
    bias/gamma/beta into a single (3, Hp) f32 slab.  Call once, reuse across
    forward calls (keeps the hot path free of full-weight HBM rewrites)."""
    D_in, H = params["w"].shape
    Kp = _round_up(D_in, 128)        # lane-aligned K, NOT rounded to block_k
    Hp = _round_up(H, 128)           # lane-dense output
    tk = _pick_tile(Kp, block_k)     # divides Kp exactly -> zero K padding waste
    tn = _pick_tile(Hp, block_n)

    w_p = _pad2d(params["w"].astype(jnp.float32), Kp, Hp).astype(jnp.bfloat16)

    b = params["b"].astype(jnp.float32).reshape(1, -1)
    g = params.get("gamma", jnp.ones((H,), jnp.float32)).astype(jnp.float32).reshape(1, -1)
    be = params.get("beta", jnp.zeros((H,), jnp.float32)).astype(jnp.float32).reshape(1, -1)
    # Zero padding of gamma/beta keeps padded output columns exactly 0 in the
    # BN path (scale=0, shift=0) -- required by the final slice.
    bgb = _pad2d(jnp.concatenate([b, g, be], axis=0), 3, Hp)

    return {"w": w_p, "bgb": bgb, "D_in": D_in, "H": H,
            "Kp": Kp, "Hp": Hp, "tk": tk, "tn": tn}


def linear_layer_forward(x, prep, *, use_bn=True):
    """x: (B, input_dim) f32.  prep: output of prepare_params()."""
    B, D_in = x.shape
    assert D_in == prep["D_in"], "input_dim mismatch with prepared params"
    Kp, Hp, tk, tn, H = prep["Kp"], prep["Hp"], prep["tk"], prep["tn"], prep["H"]

    Bp = _round_up(B, 8)             # sublane multiple
    nk = Kp // tk
    nn_tiles = Hp // tn

    # Only x is padded / cast per call (halves its DMA bytes, native MXU dtype).
    x_p = _pad2d(x.astype(jnp.float32), Bp, Kp).astype(jnp.bfloat16)

    kernel = functools.partial(_linear_layer_kernel, b_real=B, use_bn=use_bn)

    # Weight stream is the only large DMA: triple-buffer it when the K loop is
    # long enough to benefit.
    if nk >= 3:
        w_spec = pl.BlockSpec((tk, tn), lambda n, k: (k, n),
                              pipeline_mode=pl.Buffered(3))
        w_bufs = 3
    else:
        w_spec = pl.BlockSpec((tk, tn), lambda n, k: (k, n))
        w_bufs = 2

    # Derive the VMEM budget from the actual tile footprint (double-buffered x
    # and output, w_bufs weight tiles, tiny packed bias slab) with 2x + 4 MiB
    # headroom, clamped to 48 MiB so it stays safe on v7x's 64 MiB VMEM.
    est_vmem = (2 * Bp * tk * 2          # x tiles (bf16)
                + w_bufs * tk * tn * 2   # w tiles (bf16)
                + 2 * Bp * tn * 4        # output block (f32)
                + 2 * 8 * tn * 4)        # packed bias/gamma/beta (sublane-padded)
    vmem_limit = int(min(max(2 * est_vmem + (4 << 20), 32 << 20), 48 << 20))

    cost = pl.CostEstimate(
        flops=2 * Bp * Kp * Hp,
        transcendentals=0,
        bytes_accessed=x_p.size * 2 + prep["w"].size * 2
                       + prep["bgb"].size * 4 + Bp * Hp * 4,
    )

    out_padded = pl.pallas_call(
        kernel,
        out_shape=jax.ShapeDtypeStruct((Bp, Hp), jnp.float32),
        grid_spec=pltpu.PrefetchScalarGridSpec(
            num_scalar_prefetch=0,
            grid=(nn_tiles, nk),                       # N outer, K inner
            in_specs=[
                pl.BlockSpec((Bp, tk), lambda n, k: (0, k)),   # x K-tile
                w_spec,                                        # w (tk, tn) tile
                pl.BlockSpec((3, tn), lambda n, k: (0, n)),    # [bias;gamma;beta]
            ],
            out_specs=pl.BlockSpec((Bp, tn), lambda n, k: (0, n)),
        ),
        compiler_params=pltpu.CompilerParams(
            # N is independent (megacore-shardable on v7x); K is a reduction.
            dimension_semantics=("parallel", "arbitrary"),
            vmem_limit_bytes=vmem_limit,
        ),
        cost_estimate=cost,
    )(x_p, prep["w"], prep["bgb"])

    return out_padded[:B, :H]


def reference_forward(x, params, *, use_bn=True):
    """Pure-JAX reference (same bf16-operand matmul, f32 accumulate)."""
    h = jnp.dot(x.astype(jnp.bfloat16), params["w"].astype(jnp.bfloat16),
                preferred_element_type=jnp.float32)
    h = h + params["b"].reshape(1, -1)
    h = jnp.maximum(h, 0.0)
    if not use_bn:
        return h
    m = h.mean(0, keepdims=True)
    v = ((h - m) ** 2).mean(0, keepdims=True)
    g = params["gamma"].reshape(1, -1)
    be = params["beta"].reshape(1, -1)
    return (h - m) * jax.lax.rsqrt(v + EPS) * g + be


if __name__ == "__main__":
    key = jax.random.PRNGKey(0)
    kx, kw, kb = jax.random.split(key, 3)

    # LinearLayer(input_dim=1024, output_dim=32, act='relu', use_bn=True)
    B, input_dim, output_dim = 2, 1024, 32

    x = jax.random.normal(kx, (B, input_dim), jnp.float32)
    bound = 1.0 / (input_dim ** 0.5)
    params = {
        # stored as (in_features, out_features) == torch weight.T
        "w": jax.random.uniform(kw, (input_dim, output_dim), jnp.float32,
                                -bound, bound),
        "b": jax.random.uniform(kb, (output_dim,), jnp.float32, -bound, bound),
        "gamma": jnp.ones((output_dim,), jnp.float32),
        "beta": jnp.zeros((output_dim,), jnp.float32),
    }

    # One-time weight padding / cast (not on the per-call hot path).
    prep = prepare_params(params, block_k=512, block_n=512)

    # use_bn=True path
    out_bn = jax.block_until_ready(linear_layer_forward(x, prep, use_bn=True))
    ref_bn = reference_forward(x, params, use_bn=True)
    assert out_bn.shape == (B, output_dim)
    assert jnp.allclose(out_bn, ref_bn, atol=2e-3, rtol=2e-3), "BN path mismatch"

    # use_bn=False path
    out_nb = jax.block_until_ready(linear_layer_forward(x, prep, use_bn=False))
    ref_nb = reference_forward(x, params, use_bn=False)
    assert out_nb.shape == (B, output_dim)
    assert jnp.allclose(out_nb, ref_nb, atol=2e-3, rtol=2e-3), "no-BN path mismatch"

    print("KERNEL_OK")
</pallas_src>

<mosaic_0001>
module attributes {stable_mosaic.version = 11 : i64} {
  func.func @_linear_layer_kernel(%arg0: i32, %arg1: i32, %arg2: memref<8x512xbf16, #tpu.memory_space<vmem>>, %arg3: memref<512x128xbf16, #tpu.memory_space<vmem>>, %arg4: memref<3x128xf32, #tpu.memory_space<vmem>>, %arg5: memref<8x128xf32, #tpu.memory_space<vmem>>) attributes {dimension_semantics = [#tpu.dimension_semantics<parallel>, #tpu.dimension_semantics<arbitrary>], iteration_bounds = array<i64: 1, 2>, scalar_prefetch = 0 : i64, scratch_operands = 0 : i64, tpu.core_type = #tpu.core_type<tc>, window_params = [{transform_indices = @transform_0, window_bounds = array<i64: 8, 512>}, {transform_indices = @transform_1, window_bounds = array<i64: 512, 128>}, {transform_indices = @transform_2, window_bounds = array<i64: 3, 128>}, {transform_indices = @transform_3, window_bounds = array<i64: 8, 128>}]} {
    %c0_i32 = arith.constant 0 : i32
    %0 = arith.cmpi eq, %arg1, %c0_i32 : i32
    %1 = arith.extui %0 : i1 to i32
    %c0_i32_0 = arith.constant 0 : i32
    %2 = arith.cmpi ne, %1, %c0_i32_0 : i32
    scf.if %2 {
      %c0_9 = arith.constant 0 : index
      %c0_10 = arith.constant 0 : index
      %12 = vector.load %arg4[%c0_9, %c0_10] : memref<3x128xf32, #tpu.memory_space<vmem>>, vector<1x128xf32>
      %13 = vector.shape_cast %12 : vector<1x128xf32> to vector<1x128xf32>
      %14 = vector.broadcast %13 : vector<1x128xf32> to vector<8x128xf32>
      %c0_11 = arith.constant 0 : index
      %c0_12 = arith.constant 0 : index
      %15 = vector.load %arg5[%c0_11, %c0_12] : memref<8x128xf32, #tpu.memory_space<vmem>>, vector<8x128xf32>
      tpu.vector_store %arg5[%c0_11, %c0_12], %14 {strides = array<i32>} : memref<8x128xf32, #tpu.memory_space<vmem>>, vector<8x128xf32>,
    } else {
    }
    %c0 = arith.constant 0 : index
    %c0_1 = arith.constant 0 : index
    %3 = vector.load %arg5[%c0, %c0_1] : memref<8x128xf32, #tpu.memory_space<vmem>>, vector<8x128xf32>
    %c0_2 = arith.constant 0 : index
    %c0_3 = arith.constant 0 : index
    %4 = vector.load %arg2[%c0_2, %c0_3] : memref<8x512xbf16, #tpu.memory_space<vmem>>, vector<8x512xbf16>
    %c0_4 = arith.constant 0 : index
    %c0_5 = arith.constant 0 : index
    %5 = vector.load %arg3[%c0_4, %c0_5] : memref<512x128xbf16, #tpu.memory_space<vmem>>, vector<512x128xbf16>
    %cst = arith.constant dense<0.000000e+00> : vector<8x128xf32>
    %6 = tpu.matmul %4, %5, %cst {dimension_numbers = #tpu.dot_dimension_numbers<[1], [0], [0], [1], [0, 0, 1, 1], [], []>} : vector<8x512xbf16>, vector<512x128xbf16>, vector<8x128xf32> -> vector<8x128xf32>
    %7 = arith.addf %3, %6 : vector<8x128xf32>
    %c0_6 = arith.constant 0 : index
    %c0_7 = arith.constant 0 : index
    %8 = vector.load %arg5[%c0_6, %c0_7] : memref<8x128xf32, #tpu.memory_space<vmem>>, vector<8x128xf32>
    tpu.vector_store %arg5[%c0_6, %c0_7], %7 {strides = array<i32>} : memref<8x128xf32, #tpu.memory_space<vmem>>, vector<8x128xf32>,
    %c1_i32 = arith.constant 1 : i32
    %9 = arith.cmpi eq, %arg1, %c1_i32 : i32
    %10 = arith.extui %9 : i1 to i32
    %c0_i32_8 = arith.constant 0 : i32
    %11 = arith.cmpi ne, %10, %c0_i32_8 : i32
    scf.if %11 {
      %c0_9 = arith.constant 0 : index
      %c0_10 = arith.constant 0 : index
      %12 = vector.load %arg5[%c0_9, %c0_10] : memref<8x128xf32, #tpu.memory_space<vmem>>, vector<8x128xf32>
      %cst_11 = arith.constant 0.000000e+00 : f32
      %13 = vector.broadcast %cst_11 : f32 to vector<8x128xf32>
      %14 = arith.maximumf %12, %13 : vector<8x128xf32>
      %15 = tpu.iota {dimensions = array<i32: 0>} : vector<8x128xi32>
      %c2_i32 = arith.constant 2 : i32
      %16 = vector.broadcast %c2_i32 : i32 to vector<8x128xi32>
      %17 = arith.cmpi slt, %15, %16 : vector<8x128xi32>
      %18 = arith.extui %17 : vector<8x128xi1> to vector<8x128xi32>
      %19 = arith.sitofp %18 : vector<8x128xi32> to vector<8x128xf32>
      %20 = arith.mulf %14, %19 : vector<8x128xf32>
      %cst_12 = arith.constant dense<0.000000e+00> : vector<128xf32>
      %21 = vector.multi_reduction <add>, %20, %cst_12 [0] : vector<8x128xf32> to vector<128xf32>
      %22 = vector.shape_cast %21 : vector<128xf32> to vector<1x128xf32>
      %cst_13 = arith.constant 5.000000e-01 : f32
      %23 = vector.broadcast %cst_13 : f32 to vector<1x128xf32>
      %24 = arith.mulf %22, %23 : vector<1x128xf32>
      %25 = vector.broadcast %24 : vector<1x128xf32> to vector<8x128xf32>
      %26 = arith.subf %14, %25 : vector<8x128xf32>
      %27 = arith.mulf %26, %19 : vector<8x128xf32>
      %28 = arith.mulf %27, %27 : vector<8x128xf32>
      %cst_14 = arith.constant dense<0.000000e+00> : vector<128xf32>
      %29 = vector.multi_reduction <add>, %28, %cst_14 [0] : vector<8x128xf32> to vector<128xf32>
      %30 = vector.shape_cast %29 : vector<128xf32> to vector<1x128xf32>
      %cst_15 = arith.constant 5.000000e-01 : f32
      %31 = vector.broadcast %cst_15 : f32 to vector<1x128xf32>
      %32 = arith.mulf %30, %31 : vector<1x128xf32>
      %c1 = arith.constant 1 : index
      %c0_16 = arith.constant 0 : index
      %33 = vector.load %arg4[%c1, %c0_16] : memref<3x128xf32, #tpu.memory_space<vmem>>, vector<1x128xf32>
      %cst_17 = arith.constant 9.99999974E-6 : f32
      %34 = vector.broadcast %cst_17 : f32 to vector<1x128xf32>
      %35 = arith.addf %32, %34 : vector<1x128xf32>
      %36 = math.rsqrt %35 : vector<1x128xf32>
      %37 = arith.mulf %33, %36 : vector<1x128xf32>
      %c2 = arith.constant 2 : index
      %c0_18 = arith.constant 0 : index
      %38 = vector.load %arg4[%c2, %c0_18] : memref<3x128xf32, #tpu.memory_space<vmem>>, vector<1x128xf32>
      %39 = arith.mulf %24, %37 : vector<1x128xf32>
      %40 = arith.subf %38, %39 : vector<1x128xf32>
      %41 = vector.broadcast %37 : vector<1x128xf32> to vector<8x128xf32>
      %42 = arith.mulf %14, %41 : vector<8x128xf32>
      %43 = vector.broadcast %40 : vector<1x128xf32> to vector<8x128xf32>
      %44 = arith.addf %42, %43 : vector<8x128xf32>
      %c0_19 = arith.constant 0 : index
      %c0_20 = arith.constant 0 : index
      %45 = vector.load %arg5[%c0_19, %c0_20] : memref<8x128xf32, #tpu.memory_space<vmem>>, vector<8x128xf32>
      tpu.vector_store %arg5[%c0_19, %c0_20], %44 {strides = array<i32>} : memref<8x128xf32, #tpu.memory_space<vmem>>, vector<8x128xf32>,
    } else {
    }
    return
  }
  func.func @transform_0(%arg0: i32, %arg1: i32) -> (i32, i32) {
    %c0_i32 = arith.constant 0 : i32
    %c0_i32_0 = arith.constant 0 : i32
    return %c0_i32, %arg1 : i32, i32
  }
  func.func @transform_1(%arg0: i32, %arg1: i32) -> (i32, i32) {
    %c0_i32 = arith.constant 0 : i32
    return %arg1, %arg0 : i32, i32
  }
  func.func @transform_2(%arg0: i32, %arg1: i32) -> (i32, i32) {
    %c0_i32 = arith.constant 0 : i32
    %c0_i32_0 = arith.constant 0 : i32
    return %c0_i32, %arg0 : i32, i32
  }
  func.func @transform_3(%arg0: i32, %arg1: i32) -> (i32, i32) {
    %c0_i32 = arith.constant 0 : i32
    %c0_i32_0 = arith.constant 0 : i32
    return %c0_i32, %arg0 : i32, i32
  }
}

</mosaic_0001>

<bundles_post_ra>
// kernel: tpu_custom_call.1
= control target key start
LH: loop header
LB: loop body
LE: loop exit
PB: predicated region body
PF: predicated region fallthrough
CT: control target
= control target key end

     0   :  { %8 = vsyncpa [#allocation3], 0  ;;  %s1404_s0 = inlined_call_operand.hbm [shape: bf16[8,1024], index: 0, kind: input, shape index: {}]   ;;  %s1405_s1 = inlined_call_operand.hbm [shape: bf16[1024,128], index: 1, kind: input, shape index: {}]   ;;  %s1406_s2 = inlined_call_operand.hbm [shape: f32[3,128], index: 2, kind: input, shape index: {}]   ;;  %s1407_s3 = inlined_call_operand.hbm [shape: f32[8,128], index: 3, kind: output, shape index: {}]  }
   0x1   :  { %10 = vsyncpa [#allocation3 + $0x1], 0 }
   0x2   :  { %11 = vsyncpa [#allocation6], 0 }
   0x3   :  { %13 = vsyncpa [#allocation6 + $0x1], 0 }
   0x4   :  { %14 = vsyncpa [#allocation4], 0  ;;  %s1195_s12 = smov 0   ;;  %s1197_s13 = smov 0  }
   0x5   :  { %s1199_s14 = smov 0   ;;  %s1201_s15 = smov 0  }
   0x6   :  { %s1203_s16 = smov 0   ;;  %s1205_s17 = smov 0  }
   0x7 LB: > { %s1224_s18 = sadd.s32 4294967295, %s1166_s17   ;;  %s39_s19 = sadd.s32 1, %s1154_s14  ;;  %s1166_s17 = sphi %s1205_s17, %s20_s17   ;;  %s1162_s16 = sphi %s1203_s16, %s1425_s16   ;;  %s1158_s15 = sphi %s1201_s15, %s1424_s15   ;;  %s1154_s14 = sphi %s1199_s14, %s1423_s14   ;;  %s1150_s13 = sphi %s1197_s13, %s1422_s13   ;;  %s1146_s12 = sphi %s1195_s12, %s1421_s12  }
   0x8   : > { %p46_p0 = scmp.ne.s32.totalorder %s1154_s14, %s1150_s13  ;;  %p52_p1 = scmp.ne.s32.totalorder %s1150_s13, %s1146_s12 }
   0x9   : > { %p1408_p2 = scmp.eq.s32.totalorder %s1224_s18, 0  ;;  %p776_p3 = scmp.ge.s32.totalorder %s1166_s17, 1 }
   0xa   : > { %p143_p4 = scmp.lt.s32.totalorder %s1166_s17, 3  ;;  %s1168_s22 = smov [#allocation7]  }
   0xb   : > { %p1235_p5 = por %p1408_p2, %p52_p1  ;;  %s158_s23 = sshll.u32 %s1168_s22, 4  ;;  %s159_s23 = int_to_ptr.vmem [resolvable:$true] %s158_s23 }
   0xc   : > { %p1239_p6 = pnand %p776_p3, %p143_p4  ;;  %p47_p8 = scmp.eq.s32.totalorder %s1166_s17, 0 }
   0xd   : > { %s1411_s20 = scalar_select %p1235_p5, 1, 0 }
   0xe   : > { %s1412_s21 = scalar_select %p1239_p6, 1, 0 }
   0xf   : > { %p891_p7 = pneg %p1239_p6  ;;  %s29_s25 = sadd.s32 1, %s1162_s16 }
  0x10   : > { %p1253_p10 = scmp.ge.s32.totalorder %s29_s25, 2  ;;  %p1260_p11 = por %p47_p8, %p46_p0 }
  0x11   : > { %p1248_p9 = pnand %p891_p7, %p1408_p2  ;;  %p903_p12 = scmp.lt.s32.totalorder %s1166_s17, 2 }
  0x12   : > { %s1009_s28 = scalar_lea.vmem %s159_s23, 64  ;;  %p1017_p7 = scmp.lt.s32.totalorder %s159_s23, %s159_s23 }
  0x13   : > { %p1000_p13 = pneg %p1248_p9  ;;  %p1010_p1 = scmp.ne.s32.totalorder %s159_s23, %s1009_s28 }
  0x14   : > { %p1018_p2 = scmp.lt.s32.totalorder %s1009_s28, %s1009_s28 }
  0x15   : > { %p1012_p3 = pnand %p1010_p1, %p1000_p13 }
  0x16   : > { %p1019_p5 = por %p1018_p2, %p1017_p7 }
  0x17   : > { %p1013_p4 = pneg %p1012_p3 }
  0x19   : > { %p1020_p6 = pnand %p1019_p5, %p1013_p4 }
  0x1b   : > { %1023 = shalt.err (!%p1020_p6)
}
  0x1c   : > { %894 = dma.hbm_to_vmem [thread:$0]  (!%p1248_p9), %s1406_s2, 64, %s159_s23, [#allocation6]  }
  0x1d   : > { %s1427_s25 = smov (%p1253_p10, %s29_s25), 0  ;;  %s1277_s4 = sand.u32 1, %s1154_s14  }
  0x1e   : > { %s833_s5 = sshll.u32 %s1162_s16, 8  ;;  %s36_s6 = ssub.s32 %s1162_s16, %s1427_s25 }
  0x1f   : > { %p37_p0 = scmp.eq.s32.totalorder %s36_s6, 0  ;;  %s779_s7 = sshll.u32 %s1277_s4, 4 }
  0x20   : > { %s179_s10 = scalar_lea.hbm %s1404_s0, %s833_s5  ;;  %s173_s12 = scalar_lea.vmem [#allocation2], %s779_s7 }
  0x21   : > { %s1289_s11 = scalar_select %p37_p0, %s1154_s14, %s39_s19  }
  0x22   : > { %s181_s22 = sshll.u32 %s173_s12, 4  ;;  %p1295_p2 = pnand %p903_p12, %p1260_p11  ;;  %s182_s22 = int_to_ptr.vmem [resolvable:$true] %s181_s22 }
  0x23   : > { %s782_s24 = sshll.u32 %s1277_s4, 8  ;;  %s170_s26 = scalar_lea.sflag [#allocation3], %s1277_s4 }
  0x24   : > { %p1026_p5 = pneg %p1295_p2  ;;  %s1037_s28 = scalar_lea.vmem %s182_s22, 256 }
  0x25   : > { %p1038_p6 = scmp.ne.s32.totalorder %s182_s22, %s1037_s28  ;;  %s1169_s19 = smov [#allocation2]  }
  0x26   : > { %s1042_s27 = sshll.u32 %s1169_s19, 4  ;;  %s1043_s27 = int_to_ptr.vmem [resolvable:$false] %s1042_s27 }
  0x27   : > { %p1040_p8 = pnand %p1038_p6, %p1026_p5  ;;  %s1044_s29 = scalar_lea.vmem %s1043_s27, 512 }
  0x28   : > { %p1045_p10 = scmp.lt.s32.totalorder %s182_s22, %s1043_s27  ;;  %p1046_p11 = scmp.lt.s32.totalorder %s1044_s29, %s1037_s28 }
  0x29   : > { %p1041_p9 = pneg %p1040_p8 }
  0x2a   : > { %p1047_p12 = por %p1046_p11, %p1045_p10 }
  0x2c   : > { %p1048_p13 = pnand %p1047_p12, %p1041_p9 }
  0x2e   : > { %1051 = shalt.err (!%p1048_p13)
}
  0x2f   : > { %898 = dma.hbm_to_vmem [thread:$0]  (!%p1295_p2), %s179_s10, 256, %s182_s22, %s170_s26  }
  0x30   : > { %s834_s30 = sshll.u32 %s1162_s16, 12  ;;  %s192_s4 = scalar_lea.vmem [#allocation5], %s782_s24 }
  0x31   : > { %s200_s5 = sshll.u32 %s192_s4, 4  ;;  %s188_s6 = sand.u32 1, %s1166_s17   ;;  %s201_s5 = int_to_ptr.vmem [resolvable:$true] %s200_s5 }
  0x32   : > { %s199_s9 = scalar_lea.hbm %s1405_s1, %s834_s30  ;;  %s189_s12 = scalar_lea.sflag [#allocation6], %s188_s6 }
  0x33   : > { %s1065_s28 = scalar_lea.vmem %s201_s5, 4096  ;;  %s1170_s19 = smov [#allocation5]  }
  0x34   : > { %p1066_p1 = scmp.ne.s32.totalorder %s201_s5, %s1065_s28  ;;  %s1070_s27 = sshll.u32 %s1170_s19, 4  ;;  %s1071_s27 = int_to_ptr.vmem [resolvable:$false] %s1070_s27 }
  0x35   : > { %s1072_s10 = scalar_lea.vmem %s1071_s27, 8192  ;;  %p1073_p7 = scmp.lt.s32.totalorder %s201_s5, %s1071_s27 }
  0x36   : > { %p1068_p3 = pnand %p1066_p1, %p1026_p5  ;;  %p1074_p0 = scmp.lt.s32.totalorder %s1072_s10, %s1065_s28 }
  0x38   : > { %p1069_p4 = pneg %p1068_p3  ;;  %p1075_p6 = por %p1074_p0, %p1073_p7 }
  0x3a   : > { %p1076_p8 = pnand %p1075_p6, %p1069_p4 }
  0x3c   : > { %1079 = shalt.err (!%p1076_p8)
}
  0x3d   : > { %s1171_s22 = smov 64   ;;  %s1172_s24 = smov 4  }
  0x3e   : > { %901 = dma.hbm_to_vmem [thread:$0]  (!%p1295_p2), %s199_s9, 4096, %s201_s5, %s189_s12, %s1171_s22, %s1171_s22, %s1172_s24  }
  0x3f   : > { %p1417_p9 = scmp.ne.s32.totalorder %s1412_s21, 0 }
  0x40   : > { %s214_s26 = sand.u32 (!%p1417_p9), 1, %s1150_s13   ;;  %p1418_p5 = scmp.ne.s32.totalorder (!%p1417_p9), %s1411_s20, 0 }
  0x41   : > { %212 = sbr.rel (%p1417_p9) target bundleno = 410 (0x19a), region = 32  ;;  %s786_s29 = sshll.u32 (!%p1417_p9), %s214_s26, 4 }
  0x42   : > { %s215_s30 = scalar_lea.sflag (!%p1417_p9), [#allocation3], %s214_s26  ;;  %s1321_s4 = scalar_lea.vmem (!%p1417_p9), [#allocation2], %s786_s29 }
  0x46   : > { %1129 = dma.done.wait (%p1418_p5), %s215_s30, 256  }
  0x47   : > { %1131 = vsyncadd (%p1418_p5), %s215_s30, 4294967040  ;;  %s223_s6 = sand.u32 1, %s1224_s18   ;;  %s787_s23 = sshll.u32 %s214_s26, 8 }
  0x48   : > { %s224_s5 = scalar_lea.sflag [#allocation6], %s223_s6  ;;  %s1328_s7 = scalar_lea.vmem [#allocation5], %s787_s23 }
  0x49   : > { %1133 = dma.done.wait (%p1418_p5), %s224_s5, 4096  }
  0x4a   : > { %1135 = vsyncadd (%p1418_p5), %s224_s5, 4294963200  ;;  %p1419_p2 = scmp.eq.s32.totalorder %s1224_s18, 0 }
  0x4c   : > { %1137 = dma.done.wait (%p1419_p2), [#allocation6], 64   ;;  %p1420_p10 = pmov %p1419_p2 }
  0x4d   : > { %p789_p11 = scmp.ne.s32.totalorder %s1158_s15, 0 }
  0x4e   : > { %1139 = vsyncadd (%p1420_p10), [#allocation6], 4294967232 }
  0x4f   : > { %260 = sbr.rel (%p789_p11) target bundleno = 86 (0x56), region = 48 }
  0x54   : > { %v790_v0 = vld [vmem:[#allocation7] ss:$0 sm:$0xff] }
  0x55   : > { %266 = vst [vmem:[#allocation8] sm:$0xff] %v790_v0 }
  0x56 PF: > { %v960_v1 = vld [vmem:[%s1328_s7 + $0x78] sm:$0xff]   ;;  %v964_v5 = vld [vmem:[%s1328_s7 + $0x70] sm:$0xff]   ;;  %v968_v9 = vld [vmem:[%s1328_s7 + $0x68] sm:$0xff]   ;;  %p827_p12 = scmp.ne.s32.totalorder %s1158_s15, 1 }
  0x57   : > { %v961_v2 = vld [vmem:[%s1328_s7 + $0xf8] sm:$0xff]   ;;  %835 = vmatprep.subr.bf16.mxu0 %v960_v1  ;;  %v965_v6 = vld [vmem:[%s1328_s7 + $0xf0] sm:$0xff]   ;;  %v969_v10 = vld [vmem:[%s1328_s7 + $0xe8] sm:$0xff]  }
  0x58   : > { %v962_v3 = vld [vmem:[%s1328_s7 + $0x38] sm:$0xff]   ;;  %857 = vmatprep.subr.bf16.mxu1 %v961_v2  ;;  %v966_v7 = vld [vmem:[%s1328_s7 + $0x30] sm:$0xff]   ;;  %v970_v11 = vld [vmem:[%s1328_s7 + $0x28] sm:$0xff]  }
  0x59   : > { %v963_v4 = vld [vmem:[%s1328_s7 + $0xb8] sm:$0xff]   ;;  %836 = vmatpush3.bf16.msra.mxu0 %v962_v3  ;;  %v967_v8 = vld [vmem:[%s1328_s7 + $0xb0] sm:$0xff]   ;;  %v971_v12 = vld [vmem:[%s1328_s7 + $0xa8] sm:$0xff]  }
  0x5a   : > { %858 = vmatpush3.bf16.msra.mxu1 %v963_v4  ;;  %837 = vmatprep.subr.bf16.mxu0 %v964_v5  ;;  %v972_v13 = vld [vmem:[%s1328_s7 + $0x60] sm:$0xff]   ;;  %v976_v17 = vld [vmem:[%s1328_s7 + $0x58] sm:$0xff]   ;;  %v980_v21 = vld [vmem:[%s1328_s7 + $0x50] sm:$0xff]  }
  0x5b   : > { %859 = vmatprep.subr.bf16.mxu1 %v965_v6  ;;  %v973_v14 = vld [vmem:[%s1328_s7 + $0xe0] sm:$0xff]   ;;  %v977_v18 = vld [vmem:[%s1328_s7 + $0xd8] sm:$0xff]   ;;  %v981_v22 = vld [vmem:[%s1328_s7 + $0xd0] sm:$0xff]  }
  0x5c   : > { %v974_v15 = vld [vmem:[%s1328_s7 + $0x20] sm:$0xff]   ;;  %v978_v19 = vld [vmem:[%s1328_s7 + $0x18] sm:$0xff]   ;;  %v982_v23 = vld [vmem:[%s1328_s7 + $0x10] sm:$0xff]  }
  0x5d   : > { %838 = vmatpush3.bf16.msra.mxu0 %v966_v7  ;;  %v975_v16 = vld [vmem:[%s1328_s7 + $0xa0] sm:$0xff]   ;;  %v979_v20 = vld [vmem:[%s1328_s7 + $0x98] sm:$0xff]   ;;  %v983_v24 = vld [vmem:[%s1328_s7 + $0x90] sm:$0xff]  }
  0x5e   : > { %860 = vmatpush3.bf16.msra.mxu1 %v967_v8  ;;  %839 = vmatprep.subr.bf16.mxu0 %v968_v9  ;;  %v984_v25 = vld [vmem:[%s1328_s7 + $0x48] sm:$0xff]   ;;  %v988_v29 = vld [vmem:[%s1328_s7 + $0x40] sm:$0xff]  }
  0x5f   : > { %861 = vmatprep.subr.bf16.mxu1 %v969_v10  ;;  %v985_v26 = vld [vmem:[%s1328_s7 + $0xc8] sm:$0xff]   ;;  %v989_v30 = vld [vmem:[%s1328_s7 + $0xc0] sm:$0xff]  }
  0x60   : > { %v986_v27 = vld [vmem:[%s1328_s7 + $0x8] sm:$0xff]   ;;  %v990_v31 = vld [vmem:[%s1328_s7] sm:$0xff]  }
  0x61   : > { %840 = vmatpush3.bf16.msra.mxu0 %v970_v11  ;;  %v987_v28 = vld [vmem:[%s1328_s7 + $0x88] sm:$0xff]   ;;  %v991_v32 = vld [vmem:[%s1328_s7 + $0x80] sm:$0xff]  }
  0x62   : > { %862 = vmatpush3.bf16.msra.mxu1 %v971_v12  ;;  %841 = vmatprep.subr.bf16.mxu0 %v972_v13  ;;  %v268_v33 = vld [vmem:[%s1321_s4] sm:$0xff]  ;;  %v269_v34 = vld [vmem:[%s1321_s4 + $0x8] sm:$0xff] }
  0x63   : > { %863 = vmatprep.subr.bf16.mxu1 %v973_v14  ;;  %v791_v35 = vcombine.low %v268_v33, %v268_v33  ;;  %v792_v36 = vcombine.high %v268_v33, %v268_v33  ;;  %v793_v37 = vcombine.low %v269_v34, %v269_v34  ;;  %v794_v38 = vcombine.high %v269_v34, %v269_v34  ;;  %v267_v45 = vld [vmem:[#allocation8] sm:$0xff] }
  0x65   : > { %842 = vmatpush3.bf16.msra.mxu0 %v974_v15  ;;  %572 = vmatprep.mubr.bf16.mxu0 %v792_v36 }
  0x66   : > { %864 = vmatpush3.bf16.msra.mxu1 %v975_v16  ;;  %843 = vmatprep.subr.bf16.mxu0 %v976_v17 }
  0x67   : > { %865 = vmatprep.subr.bf16.mxu1 %v977_v18  ;;  %612 = vmatprep.mubr.bf16.mxu1 %v794_v38 }
  0x69   : > { %844 = vmatpush3.bf16.msra.mxu0 %v978_v19 }
  0x6a   : > { %866 = vmatpush3.bf16.msra.mxu1 %v979_v20  ;;  %845 = vmatprep.subr.bf16.mxu0 %v980_v21 }
  0x6b   : > { %867 = vmatprep.subr.bf16.mxu1 %v981_v22 }
  0x6d   : > { %846 = vmatpush3.bf16.msra.mxu0 %v982_v23 }
  0x6e   : > { %868 = vmatpush3.bf16.msra.mxu1 %v983_v24  ;;  %847 = vmatprep.subr.bf16.mxu0 %v984_v25 }
  0x6f   : > { %869 = vmatprep.subr.bf16.mxu1 %v985_v26 }
  0x71   : > { %848 = vmatpush3.bf16.msra.mxu0 %v986_v27 }
  0x72   : > { %870 = vmatpush3.bf16.msra.mxu1 %v987_v28  ;;  %849 = vmatprep.subr.bf16.mxu0 %v988_v29 }
  0x73   : > { %871 = vmatprep.subr.bf16.mxu1 %v989_v30 }
  0x75   : > { %850 = vmatpush3.bf16.msra.mxu0 %v990_v31 }
  0x76   : > { %872 = vmatpush3.bf16.msra.mxu1 %v991_v32 }
  0x78   : > { %573 = vmatmul.mubr.bf16.vlgmr.msra.gmra.mxu0 %v791_v35 }
  0x79   : > { %613 = vmatmul.mubr.bf16.vlgmr.msra.gmra.mxu1 %v793_v37 }
 0x138   : > { %v851_v39 = vpop.f32.mrf.mxu0 }
 0x139   : > { %v873_v40 = vpop.f32.mrf.mxu1 }
 0x13a   : > { %v852_v41 = vpop.f32.mrf.mxu0 }
 0x13b   : > { %v874_v42 = vpop.f32.mrf.mxu1  ;;  %v853_v43 = vadd.f32 %v852_v41, %v851_v39 }
 0x13c   : > { %v875_v44 = vadd.f32 %v874_v42, %v873_v40  ;;  %v854_v46 = vpop.f32.mrf.mxu0 }
 0x13d   : > { %v876_v47 = vpop.f32.mrf.mxu1 }
 0x13e   : > { %v615_v48 = vadd.f32 %v875_v44, %v853_v43  ;;  %v855_v49 = vpop.f32.mrf.mxu0  ;;  %625 = sbr.rel (%p827_p12) target bundleno = 395 (0x18b), region = 52 }
 0x13f   : > { %v877_v50 = vpop.f32.mrf.mxu1 }
 0x140   : > { %v620_v51 = vadd.f32 %v615_v48, %v267_v45 }
 0x142   : > { %621 = vst [vmem:[#allocation8] sm:$0xff] %v620_v51 }
 0x143   : > { %v628_v53 = vlaneseq  ;;  %v1173_v56 = vmov 0.0   ;;  %v651_v13 = vld [vmem:[#allocation7 + $0x1] sm:$0x1]  ;;  %v655_v17 = vld [vmem:[#allocation7 + $0x2] sm:$0x1] }
 0x145   : > { %v629_v55 = vshrl.u32 %v628_v53, 7 }
 0x147   : > { %vm630_vm0 = vcmp.lt.s32.totalorder %v629_v55, 2  ;;  %v660_v14 = vsub.s32 0, %v629_v55 }
 0x148   : > { %v828_v57 = vsel %vm630_vm0, 1.0, %v1173_v56 }
 0x149   : > { %v626_v52 = vld [vmem:[#allocation8] sm:$0xff] }
 0x14a   : > { %v627_v54 = vmax.f32 %v626_v52, 0.0 }
 0x14c   : > { %v633_v58 = vmul.f32 %v828_v57, %v627_v54 }
 0x14e   : > { %v634_v59 = vrot.slane %v633_v58, 4 }
 0x150   : > { %v635_v60 = vadd.f32 %v634_v59, %v633_v58 }
 0x152   : > { %v636_v61 = vrot.slane %v635_v60, 2 }
 0x154   : > { %v637_v62 = vadd.f32 %v636_v61, %v635_v60 }
 0x156   : > { %v638_v63 = vrot.slane %v637_v62, 1 }
 0x158   : > { %v639_v0 = vadd.f32 %v638_v63, %v637_v62 }
 0x15a   : > { %v640_v1 = vmul.f32 0.5, %v639_v0 }
 0x15c   : > { %v641_v2 = vsub.f32 %v627_v54, %v640_v1 }
 0x15e   : > { %v642_v3 = vmul.f32 %v828_v57, %v641_v2 }
 0x160   : > { %v643_v4 = vmul.f32 %v642_v3, %v642_v3 }
 0x162   : > { %v644_v5 = vrot.slane %v643_v4, 4 }
 0x164   : > { %v645_v6 = vadd.f32 %v644_v5, %v643_v4 }
 0x166   : > { %v646_v7 = vrot.slane %v645_v6, 2 }
 0x168   : > { %v647_v8 = vadd.f32 %v646_v7, %v645_v6 }
 0x16a   : > { %v648_v9 = vrot.slane %v647_v8, 1 }
 0x16c   : > { %v649_v10 = vadd.f32 %v648_v9, %v647_v8 }
 0x16e   : > { %v650_v11 = vmul.f32 0.5, %v649_v10 }
 0x170   : > { %v652_v12 = vadd.f32 1e-05, %v650_v11 }
 0x172   : > { %996 = vrsqrt.f32 %v652_v12 }
 0x17f   : > { %v997_v15 = vpop.eup %996 }
 0x180   : > { %v654_v16 = vmul.f32 %v997_v15, %v651_v13 }
 0x182   : > { %v656_v18 = vmul.f32 %v654_v16, %v640_v1  ;;  %v661_v19 = vrot.slane %v654_v16, %v660_v14 }
 0x184   : > { %v657_v20 = vsub.f32 %v655_v17, %v656_v18  ;;  %v662_v21 = vmul.f32 %v661_v19, %v627_v54 }
 0x186   : > { %v666_v22 = vrot.slane %v657_v20, %v660_v14 }
 0x188   : > { %v667_v23 = vadd.f32 %v666_v22, %v662_v21 }
 0x18a   : > { %668 = vst [vmem:[#allocation8] sm:$0xff] %v667_v23 }
 0x18b PF: > { %p905_p13 = scmp.eq.s32.totalorder %s1224_s18, 1  ;;  %s1174_s15 = smov [#allocation8]  }
 0x18c   : > { %s678_s20 = sshll.u32 %s1174_s15, 4  ;;  %s679_s20 = int_to_ptr.vmem [resolvable:$true] %s678_s20 }
 0x18d   : > { %s1080_s21 = scalar_lea.vmem %s679_s20, 128  ;;  %p1087_p7 = scmp.lt.s32.totalorder %s679_s20, %s679_s20 }
 0x18e   : > { %p1081_p1 = scmp.ne.s32.totalorder %s679_s20, %s1080_s21  ;;  %p1088_p0 = scmp.lt.s32.totalorder %s1080_s21, %s1080_s21 }
 0x190   : > { %p1082_p3 = pnand %p1081_p1, %p905_p13  ;;  %p1089_p6 = por %p1088_p0, %p1087_p7 }
 0x192   : > { %p1083_p4 = pneg %p1082_p3 }
 0x194   : > { %p1090_p8 = pnand %p1089_p6, %p1083_p4 }
 0x196   : > { %1093 = shalt.err (!%p1090_p8)
}
 0x197   : > { %888 = dma.vmem_to_hbm [thread:$0]  (%p905_p13), %s679_s20, 128, %s1407_s3, [#allocation4]  }
 0x198   : > { %1141 = dma.done.wait (%p905_p13), [#allocation4], 128  }
 0x199   : > { %1143 = vsyncadd (%p905_p13), [#allocation4], 4294967168 }
 0x19a PF: > { %s20_s17 = sadd.s32 1, %s1166_s17   ;;  %s1421_s12 = smov %s1150_s13 }
 0x19b   : > { %p17_p9 = scmp.ge.s32.totalorder %s20_s17, 4   ;;  %s1422_s13 = smov %s1154_s14 }
 0x19c   : > { %s1423_s14 = smov %s1289_s11  ;;  %s1424_s15 = smov %s1162_s16 }
 0x19d   : > { %s1425_s16 = smov %s1427_s25  ;;  %19 = sbr.rel (!%p17_p9) target bundleno = 7 (0x7), region = 96 }
 0x1a2   :  { %691 = vsyncpa [#allocation3], 1 }
 0x1a3   :  { %693 = vsyncpa [#allocation3 + $0x1], 1 }
 0x1a4   :  { %694 = vsyncpa [#allocation6], 1 }
 0x1a5   :  { %696 = vsyncpa [#allocation6 + $0x1], 1 }
 0x1a6   :  { %697 = vsyncpa [#allocation4], 1 }
 0x1a7   :  { %699 = vsyncpa [#allocation4 + $0x1], 1 }

</bundles_post_ra>
